<compile_context>
chip_gen: v7x
topology: tpu7x:2x2x1
jax: 0.10.0
libtpu: 0.0.40
codegen_flags: <defaults>
</compile_context>

<pallas_src>
import jax
import jax.numpy as jnp
from jax.experimental import pallas as pl
from jax.experimental.pallas import tpu as pltpu

_SMALL_FALLBACK_ELEMS = 256 * 1024          # below ~1 MiB f32, fused XLA FMA wins
_LANE_WIDTHS = (4096, 2048, 1024, 512, 256, 128)
_TILE_TARGET_BYTES = 4 * 1024 * 1024        # ~4 MiB per tile buffer
_MIN_GRID_STEPS = 4                         # keep the double-buffer pipeline full
_VMEM_LIMIT_BYTES = 32 * 1024 * 1024        # safe on v7x (64 MiB/TC) and v5e/v6e


def _linreg_kernel(w_ref, b_ref, x_ref, o_ref):
    # w_ref / b_ref are shape-(1,) scalars in SMEM; x_ref / o_ref are VMEM tiles.
    w = w_ref[0]
    b = b_ref[0]
    o_ref[...] = (x_ref[...] * w + b).astype(o_ref.dtype)


def _pick_tile_rows(R, C, itemsize):
    """Row-tile: ~4 MiB, dtype-aware sublane alignment, (nearly) divides R."""
    sublane = max(8, 32 // max(1, itemsize))     # 8 f32, 16 bf16, 32 int8/fp8
    if R <= sublane:
        return R                                 # full-dim block is always legal

    row_bytes = C * itemsize
    target_rows = max(sublane, _TILE_TARGET_BYTES // row_bytes)
    # Prefer at least _MIN_GRID_STEPS grid steps when the array is big enough.
    if R // target_rows < _MIN_GRID_STEPS:
        target_rows = max(sublane, R // _MIN_GRID_STEPS)

    # Choose tile_rows that (nearly) evenly divides R, sublane-aligned.
    n_steps = max(1, pl.cdiv(R, target_rows))
    rows = pl.cdiv(R, n_steps)
    rows = pl.cdiv(rows, sublane) * sublane
    rows = min(rows, pl.cdiv(R, sublane) * sublane)
    return max(rows, sublane)


def linear_regression_forward_2d(x2d, weight, bias):
    """y = weight * x + bias on a lane-dense 2-D array; 1-D row grid."""
    R, C = x2d.shape
    itemsize = jnp.dtype(x2d.dtype).itemsize
    tile_rows = _pick_tile_rows(R, C, itemsize)
    grid = (pl.cdiv(R, tile_rows),)
    return pl.pallas_call(
        _linreg_kernel,
        out_shape=jax.ShapeDtypeStruct((R, C), x2d.dtype),
        grid_spec=pltpu.PrefetchScalarGridSpec(
            num_scalar_prefetch=0,
            grid=grid,
            in_specs=[
                pl.BlockSpec(memory_space=pltpu.SMEM),           # weight (1,)
                pl.BlockSpec(memory_space=pltpu.SMEM),           # bias   (1,)
                pl.BlockSpec((tile_rows, C), lambda i: (i, 0)),  # x tile
            ],
            out_specs=pl.BlockSpec((tile_rows, C), lambda i: (i, 0)),
        ),
        compiler_params=pltpu.CompilerParams(
            dimension_semantics=("parallel",),
            vmem_limit_bytes=_VMEM_LIMIT_BYTES,
        ),
        cost_estimate=pl.CostEstimate(
            flops=2 * R * C,
            transcendentals=0,
            bytes_accessed=2 * R * C * itemsize,   # read + write
        ),
    )(weight, bias, x2d)


def _lane_dense_view(flat, total):
    """Return (x2d, padded_total): a lane-dense 2-D view, padding if needed."""
    for lanes in _LANE_WIDTHS:
        if total % lanes == 0 and total // lanes >= 8:
            return flat.reshape(total // lanes, lanes), total
    # Ragged / narrow sizes (e.g. (N, 1) inputs): pad to a multiple of 1024
    # (8 x 128) so every store is unmasked and every vreg lane/sublane is used.
    padded = pl.cdiv(total, 1024) * 1024
    if padded != total:
        flat = jnp.pad(flat, (0, padded - total))
    for lanes in _LANE_WIDTHS:
        if padded % lanes == 0 and padded // lanes >= 8:
            return flat.reshape(padded // lanes, lanes), padded
    return flat.reshape(padded // 128, 128), padded   # always reachable fallback


def linear_regression_model(x, weight, bias, force_pallas=False):
    """Forward pass of LinearRegressionModel for arbitrary-rank x."""
    total = x.size
    if total < _SMALL_FALLBACK_ELEMS and not force_pallas:
        # Launch + DMA overhead dominates small/mid problems; XLA fuses this FMA
        # at the HBM roofline already.
        return weight * x + bias

    orig_shape = x.shape
    flat = x.reshape(-1)
    x2d, padded = _lane_dense_view(flat, total)
    y2d = linear_regression_forward_2d(x2d, weight, bias)
    y_flat = y2d.reshape(-1)
    if padded != total:
        y_flat = y_flat[:total]
    return y_flat.reshape(orig_shape)


if __name__ == "__main__":
    key = jax.random.PRNGKey(0)
    k_w, k_b, k_x = jax.random.split(key, 3)

    # Parameters matching nn.Parameter(torch.rand(1)) shapes.
    weight = jax.random.uniform(k_w, (1,), dtype=jnp.float32)
    bias = jax.random.uniform(k_b, (1,), dtype=jnp.float32)

    # Small 4-D input; force the Pallas path so the kernel is exercised.
    x = jax.random.normal(k_x, (2, 4, 16, 16), dtype=jnp.float32)
    y = jax.block_until_ready(linear_regression_model(x, weight, bias, force_pallas=True))
    y_ref = weight * x + bias
    assert jnp.allclose(y, y_ref, atol=1e-6, rtol=1e-6), "mismatch (kernel path)"

    # Classic (N, 1) regression input exercises the pad-to-lane-dense path.
    x_col = jax.random.normal(k_x, (37, 1), dtype=jnp.float32)
    y_col = jax.block_until_ready(
        linear_regression_model(x_col, weight, bias, force_pallas=True))
    assert jnp.allclose(y_col, weight * x_col + bias, atol=1e-6, rtol=1e-6), \
        "mismatch (padded lane-dense path)"

    # Tiny input without force_pallas takes the fused-XLA fallback.
    x_small = jax.random.normal(k_x, (8, 128), dtype=jnp.float32)
    y_small = jax.block_until_ready(linear_regression_model(x_small, weight, bias))
    assert jnp.allclose(y_small, weight * x_small + bias, atol=1e-6, rtol=1e-6), \
        "mismatch (fallback path)"

    print("KERNEL_OK")
</pallas_src>

<mosaic_0001>
module attributes {stable_mosaic.version = 11 : i64} {
  func.func @_linreg_kernel(%arg0: i32, %arg1: memref<1xf32, #tpu.memory_space<smem>>, %arg2: memref<1xf32, #tpu.memory_space<smem>>, %arg3: memref<8x256xf32, #tpu.memory_space<vmem>>, %arg4: memref<8x256xf32, #tpu.memory_space<vmem>>) attributes {dimension_semantics = [#tpu.dimension_semantics<parallel>], iteration_bounds = array<i64: 1>, scalar_prefetch = 0 : i64, scratch_operands = 0 : i64, tpu.core_type = #tpu.core_type<tc>, window_params = [{transform_indices = @transform_0, window_bounds = array<i64: 1>}, {transform_indices = @transform_1, window_bounds = array<i64: 1>}, {transform_indices = @transform_2, window_bounds = array<i64: 8, 256>}, {transform_indices = @transform_3, window_bounds = array<i64: 8, 256>}]} {
    %c0 = arith.constant 0 : index
    %0 = memref.load %arg1[%c0] : memref<1xf32, #tpu.memory_space<smem>>
    %c0_0 = arith.constant 0 : index
    %1 = memref.load %arg2[%c0_0] : memref<1xf32, #tpu.memory_space<smem>>
    %c0_1 = arith.constant 0 : index
    %c0_2 = arith.constant 0 : index
    %2 = vector.load %arg3[%c0_1, %c0_2] : memref<8x256xf32, #tpu.memory_space<vmem>>, vector<8x256xf32>
    %3 = vector.broadcast %0 : f32 to vector<8x256xf32>
    %4 = arith.mulf %2, %3 : vector<8x256xf32>
    %5 = vector.broadcast %1 : f32 to vector<8x256xf32>
    %6 = arith.addf %4, %5 : vector<8x256xf32>
    %c0_3 = arith.constant 0 : index
    %c0_4 = arith.constant 0 : index
    %7 = vector.load %arg4[%c0_3, %c0_4] : memref<8x256xf32, #tpu.memory_space<vmem>>, vector<8x256xf32>
    tpu.vector_store %arg4[%c0_3, %c0_4], %6 {strides = array<i32>} : memref<8x256xf32, #tpu.memory_space<vmem>>, vector<8x256xf32>,
    return
  }
  func.func @transform_0(%arg0: i32) -> i32 {
    %c0_i32 = arith.constant 0 : i32
    %c0_i32_0 = arith.constant 0 : i32
    return %c0_i32 : i32
  }
  func.func @transform_1(%arg0: i32) -> i32 {
    %c0_i32 = arith.constant 0 : i32
    %c0_i32_0 = arith.constant 0 : i32
    return %c0_i32 : i32
  }
  func.func @transform_2(%arg0: i32) -> (i32, i32) {
    %c0_i32 = arith.constant 0 : i32
    %c0_i32_0 = arith.constant 0 : i32
    return %arg0, %c0_i32 : i32, i32
  }
  func.func @transform_3(%arg0: i32) -> (i32, i32) {
    %c0_i32 = arith.constant 0 : i32
    %c0_i32_0 = arith.constant 0 : i32
    return %arg0, %c0_i32 : i32, i32
  }
}

</mosaic_0001>

<bundles_post_ra>
// kernel: tpu_custom_call.1
= control target key start
LH: loop header
LB: loop body
LE: loop exit
PB: predicated region body
PF: predicated region fallthrough
CT: control target
= control target key end

     0   :  { %10 = vsyncpa [#allocation5], 0  ;;  %s158_s0 = inlined_call_operand.<no memory space> [shape: f32[1], index: 0, kind: input, shape index: {}]   ;;  %s159_s1 = inlined_call_operand.<no memory space> [shape: f32[1], index: 1, kind: input, shape index: {}]   ;;  %s160_s2 = inlined_call_operand.hbm [shape: f32[8,256], index: 2, kind: input, shape index: {}]   ;;  %s161_s3 = inlined_call_operand.hbm [shape: f32[8,256], index: 3, kind: output, shape index: {}]  }
   0x1   :  { %11 = vsyncpa [#allocation6], 0  ;;  %s106_s12 = smov [#allocation4]   ;;  %s58_s16 = scalar_lea.hbm %s160_s2, 256 }
   0x2   :  { %s22_s13 = sshll.u32 %s106_s12, 4  ;;  %p59_p0 = scmp.ne.s32.totalorder %s160_s2, %s58_s16  ;;  %s23_s13 = int_to_ptr.vmem [resolvable:$true] %s22_s13 }
   0x3   :  { %p62_p1 = scmp.lt.u32.totalorder %s58_s16, %s160_s2 }
   0x5   :  { %p64_p2 = pnand %p62_p1, %p59_p0 }
   0x7   :  { %67 = shalt.err (!%p64_p2)
}
   0x8   :  { %s68_s21 = scalar_lea.vmem %s23_s13, 256  ;;  %p73_p4 = scmp.lt.s32.totalorder %s23_s13, %s23_s13 }
   0x9   :  { %p69_p3 = scmp.ne.s32.totalorder %s23_s13, %s68_s21  ;;  %p74_p5 = scmp.lt.s32.totalorder %s68_s21, %s68_s21 }
   0xb   :  { %p75_p6 = por %p74_p5, %p73_p4 }
   0xd   :  { %p76_p7 = pnand %p75_p6, %p69_p3 }
   0xf   :  { %79 = shalt.err (!%p76_p7)
}
  0x10   :  { %25 = dma.hbm_to_vmem [thread:$0]  %s160_s2, 256, %s23_s13, [#allocation5]  }
  0x11   :  { %102 = dma.done.wait [#allocation5], 256  }
  0x12   :  { %103 = vsyncadd [#allocation5], 4294967040  ;;  %v33_v0 = vstv %s158_s0  ;;  %v31_v1 = vld [vmem:[#allocation4] sm:$0xff]  ;;  %v36_v2 = vstv %s159_s1  ;;  %v32_v3 = vld [vmem:[#allocation4 + $0x8] sm:$0xff]  ;;  %s107_s28 = smov [#allocation7]  }
  0x13   :  { %s47_s29 = sshll.u32 %s107_s28, 4  ;;  %v34_v4 = vmul.f32 %v33_v0, %v31_v1  ;;  %v35_v5 = vmul.f32 %v33_v0, %v32_v3  ;;  %s48_s29 = int_to_ptr.vmem [resolvable:$true] %s47_s29 }
  0x14   :  { %s80_s2 = scalar_lea.vmem %s48_s29, 256  ;;  %p85_p9 = scmp.lt.s32.totalorder %s48_s29, %s48_s29 }
  0x15   :  { %v37_v6 = vadd.f32 %v36_v2, %v34_v4  ;;  %v38_v7 = vadd.f32 %v36_v2, %v35_v5  ;;  %p81_p8 = scmp.ne.s32.totalorder %s48_s29, %s80_s2  ;;  %p86_p10 = scmp.lt.s32.totalorder %s80_s2, %s80_s2 }
  0x17   :  { %39 = vst [vmem:[#allocation7] sm:$0xff] %v37_v6  ;;  %40 = vst [vmem:[#allocation7 + $0x8] sm:$0xff] %v38_v7  ;;  %p87_p11 = por %p86_p10, %p85_p9 }
  0x19   :  { %p88_p12 = pnand %p87_p11, %p81_p8 }
  0x1b   :  { %91 = shalt.err (!%p88_p12)
}
  0x1c   :  { %s92_s1 = scalar_lea.hbm %s161_s3, 256 }
  0x1d   :  { %p93_p13 = scmp.ne.s32.totalorder %s161_s3, %s92_s1  ;;  %p96_p0 = scmp.lt.u32.totalorder %s92_s1, %s161_s3 }
  0x1f   :  { %p98_p1 = pnand %p96_p0, %p93_p13 }
  0x21   :  { %101 = shalt.err (!%p98_p1)
}
  0x22   :  { %50 = dma.vmem_to_hbm [thread:$0]  %s48_s29, 256, %s161_s3, [#allocation6]  }
  0x23   :  { %104 = dma.done.wait [#allocation6], 256  }
  0x24   :  { %105 = vsyncadd [#allocation6], 4294967040 }
  0x25   :  { %54 = vsyncpa [#allocation5], 1 }
  0x26   :  { %55 = vsyncpa [#allocation6], 1 }

</bundles_post_ra>
